<compile_context>
chip_gen: v7x
topology: tpu7x:2x2x1
jax: 0.10.0
libtpu: 0.0.40
codegen_flags: <defaults>
</compile_context>

<pallas_src>
import functools
import math

import jax
import jax.numpy as jnp
from jax import lax
from jax.experimental import pallas as pl
from jax.experimental.pallas import tpu as pltpu


def _bert_attention_kernel(x_ref, mask_ref,
                           wqkv_ref, wo_ref,
                           bqkv_ref, bo_ref,
                           gamma_ref, beta_ref,
                           out_ref, scores_ref,
                           ctx_ref,
                           *, num_heads, scale, eps):
    x = x_ref[0]                                         # (S, H), native dtype
    S, H = x.shape
    Dh = H // num_heads
    cd = x.dtype                                         # MXU operand dtype

    # Fused QKV projection. nn.Linear weight is [out, in] -> contract last dims
    # of both operands; native-dtype operands on the MXU, f32 accumulation.
    dn = (((1,), (1,)), ((), ()))
    qkv = lax.dot_general(x, wqkv_ref[...], dn,
                          preferred_element_type=jnp.float32)
    qkv = qkv + bqkv_ref[...].astype(jnp.float32)        # (S, 3H) f32

    attn_mask = mask_ref[...].reshape(1, S).astype(jnp.float32)

    for h in range(num_heads):
        sl = slice(h * Dh, (h + 1) * Dh)
        q_h = qkv[:, sl].astype(cd)
        k_h = qkv[:, H + h * Dh:H + (h + 1) * Dh].astype(cd)
        v_h = qkv[:, 2 * H + h * Dh:2 * H + (h + 1) * Dh].astype(cd)

        # QK^T with no explicit transpose: contract the last (Dh) dims.
        s_h = lax.dot_general(q_h, k_h, dn,
                              preferred_element_type=jnp.float32) * scale + attn_mask
        scores_ref[0, h, :, :] = s_h.astype(scores_ref.dtype)

        # softmax in f32; normalization deferred past the P.V matmul.
        m_h = jnp.max(s_h, axis=-1, keepdims=True)
        e_h = jnp.exp(s_h - m_h)
        r_h = jnp.sum(e_h, axis=-1, keepdims=True)        # (S, 1)
        ctx_h = jnp.dot(e_h.astype(cd), v_h,
                        preferred_element_type=jnp.float32)
        ctx_ref[:, sl] = (ctx_h * pl.reciprocal(r_h, approx=False)).astype(ctx_ref.dtype)
        # TODO(synk): attention-prob dropout and head_mask multiply omitted
        # (dropout is identity in eval mode; head_mask=None in this forward).

    # BertSelfOutput: dense + (dropout: identity) + residual + LayerNorm, f32.
    proj = lax.dot_general(ctx_ref[...], wo_ref[...], dn,
                           preferred_element_type=jnp.float32)
    y = proj + bo_ref[...].astype(jnp.float32) + x.astype(jnp.float32)
    mu = jnp.mean(y, axis=-1, keepdims=True)
    yc = y - mu
    var = jnp.mean(yc * yc, axis=-1, keepdims=True)
    out = (yc * lax.rsqrt(var + eps) * gamma_ref[...].astype(jnp.float32)
           + beta_ref[...].astype(jnp.float32))
    out_ref[...] = out[None].astype(out_ref.dtype)


def bert_attention(hidden_states, attention_mask,
                   wq, bq, wk, bk, wv, bv, wo, bo, gamma, beta,
                   *, num_heads, eps=1e-12, scores_dtype=None):
    """hidden_states: [B,S,H]; attention_mask: additive mask broadcastable to
    [B,1,1,S]; wq/wk/wv/wo: [H,H] (nn.Linear layout); bq/bk/bv/bo/gamma/beta: [H]."""
    B, S, H = hidden_states.shape
    assert H % num_heads == 0
    Dh = H // num_heads
    scale = 1.0 / math.sqrt(Dh)

    dt = hidden_states.dtype
    scores_dtype = dt if scores_dtype is None else scores_dtype
    it = jnp.dtype(dt).itemsize
    sit = jnp.dtype(scores_dtype).itemsize

    mask4 = attention_mask.reshape(B, 1, 1, S).astype(jnp.float32)
    # Fuse Q/K/V weights and biases; keep the nn.Linear [out, in] layout.
    wqkv = jnp.concatenate([wq, wk, wv], axis=0).astype(dt)          # (3H, H)
    bqkv = jnp.concatenate([bq, bk, bv], axis=0).reshape(1, 3 * H).astype(dt)
    wo_c = wo.astype(dt)
    bo_r = bo.reshape(1, H).astype(dt)
    gamma_r = gamma.reshape(1, H)
    beta_r = beta.reshape(1, H)

    kernel = functools.partial(_bert_attention_kernel,
                               num_heads=num_heads, scale=scale, eps=eps)

    # Cost estimate (per real element sizes / fused layout).
    flops = int(B * (8 * S * H * H + 4 * S * S * H))
    transcendentals = int(B * num_heads * S * S + B * num_heads * S + B * S)
    bytes_accessed = int(2 * B * S * H * it                       # x in + out
                         + 4 * B * S                              # mask (f32)
                         + (4 * H * H + 4 * H) * it + 8 * H       # weights/biases + LN
                         + B * num_heads * S * S * sit)           # scores writeback

    # Explicit VMEM budget (default scoped limit is 16/32 MiB on v5e/v6e-v7x).
    vmem_bytes = (2 * S * H * it                                   # x, double-buffered
                  + 2 * 4 * S                                      # mask
                  + 4 * H * H * it + 4 * H * it + 8 * H            # resident weights (single-buffered)
                  + 2 * S * H * it                                 # out, double-buffered
                  + 2 * num_heads * S * S * sit                    # scores, double-buffered
                  + S * H * it                                     # ctx scratch
                  + 4 * S * 3 * H                                  # qkv f32 intermediate
                  + 4 * 4 * S * S)                                 # per-head s/e/temp headroom
    vmem_limit = min(128 * 1024 * 1024, max(32 * 1024 * 1024, int(vmem_bytes * 1.4)))

    # Grid-invariant blocks: single-buffered (never change across the batch grid).
    w_qkv_spec = pl.BlockSpec((3 * H, H), lambda b: (0, 0), pipeline_mode=pl.Buffered(1))
    w_o_spec = pl.BlockSpec((H, H), lambda b: (0, 0), pipeline_mode=pl.Buffered(1))
    vec3_spec = pl.BlockSpec((1, 3 * H), lambda b: (0, 0), pipeline_mode=pl.Buffered(1))
    vec_spec = pl.BlockSpec((1, H), lambda b: (0, 0), pipeline_mode=pl.Buffered(1))

    out, scores = pl.pallas_call(
        kernel,
        out_shape=(jax.ShapeDtypeStruct((B, S, H), dt),
                   jax.ShapeDtypeStruct((B, num_heads, S, S), scores_dtype)),
        grid_spec=pltpu.PrefetchScalarGridSpec(
            num_scalar_prefetch=0,
            grid=(B,),
            in_specs=[
                pl.BlockSpec((1, S, H), lambda b: (b, 0, 0)),        # x
                pl.BlockSpec((1, 1, 1, S), lambda b: (b, 0, 0, 0)),  # additive mask
                w_qkv_spec, w_o_spec,                                # fused Wqkv, Wo
                vec3_spec, vec_spec,                                 # fused bqkv, bo
                vec_spec, vec_spec,                                  # gamma, beta
            ],
            out_specs=[
                pl.BlockSpec((1, S, H), lambda b: (b, 0, 0)),
                pl.BlockSpec((1, num_heads, S, S), lambda b: (b, 0, 0, 0)),
            ],
            scratch_shapes=[pltpu.VMEM((S, H), dt)],                 # per-step context
        ),
        compiler_params=pltpu.CompilerParams(
            dimension_semantics=("parallel",),
            vmem_limit_bytes=vmem_limit),
        cost_estimate=pl.CostEstimate(flops=flops,
                                      transcendentals=transcendentals,
                                      bytes_accessed=bytes_accessed),
    )(hidden_states, mask4,
      wqkv, wo_c,
      bqkv, bo_r,
      gamma_r, beta_r)
    return out, scores


def _reference(x, mask, wq, bq, wk, bk, wv, bv, wo, bo, gamma, beta,
               *, num_heads, eps=1e-12):
    B, S, H = x.shape
    Dh = H // num_heads
    q = x @ wq.T + bq
    k = x @ wk.T + bk
    v = x @ wv.T + bv
    split = lambda t: t.reshape(B, S, num_heads, Dh).transpose(0, 2, 1, 3)
    qh, kh, vh = split(q), split(k), split(v)
    scores = jnp.einsum('bhqd,bhkd->bhqk', qh, kh) / math.sqrt(Dh)
    scores = scores + mask.reshape(B, 1, 1, S)
    probs = jax.nn.softmax(scores, axis=-1)
    ctx = jnp.einsum('bhqk,bhkd->bhqd', probs, vh).transpose(0, 2, 1, 3).reshape(B, S, H)
    y = ctx @ wo.T + bo + x
    mu = y.mean(-1, keepdims=True)
    var = ((y - mu) ** 2).mean(-1, keepdims=True)
    out = (y - mu) / jnp.sqrt(var + eps) * gamma + beta
    return out, scores


if __name__ == "__main__":
    key = jax.random.PRNGKey(0)
    ks = jax.random.split(key, 12)
    B, S, H, NH = 2, 8, 32, 4

    x = jax.random.normal(ks[0], (B, S, H), dtype=jnp.float32)
    keep = (jax.random.uniform(ks[1], (B, 1, 1, S)) > 0.2).astype(jnp.float32)
    attention_mask = (1.0 - keep) * -10000.0            # standard BERT additive mask

    init = lambda k, shape: jax.random.normal(k, shape, dtype=jnp.float32) * 0.05
    wq, wk, wv, wo = (init(ks[i], (H, H)) for i in range(2, 6))
    bq, bk, bv, bo = (init(ks[i], (H,)) for i in range(6, 10))
    gamma = 1.0 + 0.1 * jax.random.normal(ks[10], (H,), dtype=jnp.float32)
    beta = 0.1 * jax.random.normal(ks[11], (H,), dtype=jnp.float32)

    out, scores = bert_attention(x, attention_mask, wq, bq, wk, bk, wv, bv, wo, bo,
                                 gamma, beta, num_heads=NH)
    out, scores = jax.block_until_ready((out, scores))

    ref_out, ref_scores = _reference(x, attention_mask, wq, bq, wk, bk, wv, bv, wo, bo,
                                     gamma, beta, num_heads=NH)

    assert out.shape == (B, S, H)
    assert scores.shape == (B, NH, S, S)
    assert jnp.allclose(scores, ref_scores, atol=1e-4, rtol=1e-4), \
        float(jnp.max(jnp.abs(scores - ref_scores)))
    assert jnp.allclose(out, ref_out, atol=1e-4, rtol=1e-4), \
        float(jnp.max(jnp.abs(out - ref_out)))

    print("KERNEL_OK")
</pallas_src>

<mosaic_0001>
module attributes {stable_mosaic.version = 11 : i64} {
  func.func @_bert_attention_kernel(%arg0: i32, %arg1: memref<1x8x32xf32, #tpu.memory_space<vmem>>, %arg2: memref<1x1x1x8xf32, #tpu.memory_space<vmem>>, %arg3: memref<96x32xf32, #tpu.memory_space<vmem>>, %arg4: memref<32x32xf32, #tpu.memory_space<vmem>>, %arg5: memref<1x96xf32, #tpu.memory_space<vmem>>, %arg6: memref<1x32xf32, #tpu.memory_space<vmem>>, %arg7: memref<1x32xf32, #tpu.memory_space<vmem>>, %arg8: memref<1x32xf32, #tpu.memory_space<vmem>>, %arg9: memref<1x8x32xf32, #tpu.memory_space<vmem>>, %arg10: memref<1x4x8x8xf32, #tpu.memory_space<vmem>>, %arg11: memref<8x32xf32, #tpu.memory_space<vmem>>) attributes {dimension_semantics = [#tpu.dimension_semantics<parallel>], iteration_bounds = array<i64: 2>, scalar_prefetch = 0 : i64, scratch_operands = 1 : i64, tpu.core_type = #tpu.core_type<tc>, window_params = [{transform_indices = @transform_0, window_bounds = array<i64: 1, 8, 32>}, {transform_indices = @transform_1, window_bounds = array<i64: 1, 1, 1, 8>}, {pipeline_mode = #tpu.pipeline_mode<synchronous>, transform_indices = @transform_2, window_bounds = array<i64: 96, 32>}, {pipeline_mode = #tpu.pipeline_mode<synchronous>, transform_indices = @transform_3, window_bounds = array<i64: 32, 32>}, {pipeline_mode = #tpu.pipeline_mode<synchronous>, transform_indices = @transform_4, window_bounds = array<i64: 1, 96>}, {pipeline_mode = #tpu.pipeline_mode<synchronous>, transform_indices = @transform_5, window_bounds = array<i64: 1, 32>}, {pipeline_mode = #tpu.pipeline_mode<synchronous>, transform_indices = @transform_6, window_bounds = array<i64: 1, 32>}, {pipeline_mode = #tpu.pipeline_mode<synchronous>, transform_indices = @transform_7, window_bounds = array<i64: 1, 32>}, {transform_indices = @transform_8, window_bounds = array<i64: 1, 8, 32>}, {transform_indices = @transform_9, window_bounds = array<i64: 1, 4, 8, 8>}]} {
    %c0 = arith.constant 0 : index
    %c0_0 = arith.constant 0 : index
    %c0_1 = arith.constant 0 : index
    %0 = vector.load %arg1[%c0, %c0_0, %c0_1] : memref<1x8x32xf32, #tpu.memory_space<vmem>>, vector<1x8x32xf32>
    %1 = vector.shape_cast %0 : vector<1x8x32xf32> to vector<8x32xf32>
    %c0_2 = arith.constant 0 : index
    %c0_3 = arith.constant 0 : index
    %2 = vector.load %arg3[%c0_2, %c0_3] : memref<96x32xf32, #tpu.memory_space<vmem>>, vector<96x32xf32>
    %cst = arith.constant dense<0.000000e+00> : vector<8x96xf32>
    %3 = tpu.matmul %1, %2, %cst {dimension_numbers = #tpu.dot_dimension_numbers<[1], [1], [0], [0], [0, 0, 1, 0], [], []>} : vector<8x32xf32>, vector<96x32xf32>, vector<8x96xf32> -> vector<8x96xf32>
    %c0_4 = arith.constant 0 : index
    %c0_5 = arith.constant 0 : index
    %4 = vector.load %arg5[%c0_4, %c0_5] : memref<1x96xf32, #tpu.memory_space<vmem>>, vector<1x96xf32>
    %5 = vector.broadcast %4 : vector<1x96xf32> to vector<8x96xf32>
    %6 = arith.addf %3, %5 : vector<8x96xf32>
    %c0_6 = arith.constant 0 : index
    %c0_7 = arith.constant 0 : index
    %c0_8 = arith.constant 0 : index
    %c0_9 = arith.constant 0 : index
    %7 = vector.load %arg2[%c0_6, %c0_7, %c0_8, %c0_9] : memref<1x1x1x8xf32, #tpu.memory_space<vmem>>, vector<1x1x1x8xf32>
    %8 = vector.shape_cast %7 : vector<1x1x1x8xf32> to vector<1x8xf32>
    %9 = vector.extract_strided_slice %6 {offsets = [0, 0], sizes = [8, 8], strides = [1, 1]} : vector<8x96xf32> to vector<8x8xf32>
    %10 = vector.extract_strided_slice %6 {offsets = [0, 32], sizes = [8, 8], strides = [1, 1]} : vector<8x96xf32> to vector<8x8xf32>
    %11 = vector.extract_strided_slice %6 {offsets = [0, 64], sizes = [8, 8], strides = [1, 1]} : vector<8x96xf32> to vector<8x8xf32>
    %cst_10 = arith.constant dense<0.000000e+00> : vector<8x8xf32>
    %12 = tpu.matmul %9, %10, %cst_10 {dimension_numbers = #tpu.dot_dimension_numbers<[1], [1], [0], [0], [0, 0, 1, 0], [], []>} : vector<8x8xf32>, vector<8x8xf32>, vector<8x8xf32> -> vector<8x8xf32>
    %cst_11 = arith.constant 0.353553385 : f32
    %13 = vector.broadcast %cst_11 : f32 to vector<8x8xf32>
    %14 = arith.mulf %12, %13 : vector<8x8xf32>
    %15 = vector.broadcast %8 : vector<1x8xf32> to vector<8x8xf32>
    %16 = arith.addf %14, %15 : vector<8x8xf32>
    %c0_12 = arith.constant 0 : index
    %c0_13 = arith.constant 0 : index
    %c0_14 = arith.constant 0 : index
    %c0_15 = arith.constant 0 : index
    %17 = vector.load %arg10[%c0_12, %c0_13, %c0_14, %c0_15] : memref<1x4x8x8xf32, #tpu.memory_space<vmem>>, vector<1x1x8x8xf32>
    %18 = vector.shape_cast %17 : vector<1x1x8x8xf32> to vector<8x8xf32>
    %19 = vector.shape_cast %16 : vector<8x8xf32> to vector<1x1x8x8xf32>
    tpu.vector_store %arg10[%c0_12, %c0_13, %c0_14, %c0_15], %19 {strides = array<i32>} : memref<1x4x8x8xf32, #tpu.memory_space<vmem>>, vector<1x1x8x8xf32>,
    %cst_16 = arith.constant dense<0xFF800000> : vector<8xf32>
    %20 = vector.multi_reduction <maximumf>, %16, %cst_16 [1] : vector<8x8xf32> to vector<8xf32>
    %21 = vector.shape_cast %20 : vector<8xf32> to vector<8x1xf32>
    %22 = vector.broadcast %21 : vector<8x1xf32> to vector<8x8xf32>
    %23 = arith.subf %16, %22 : vector<8x8xf32>
    %24 = math.exp %23 : vector<8x8xf32>
    %cst_17 = arith.constant dense<0.000000e+00> : vector<8xf32>
    %25 = vector.multi_reduction <add>, %24, %cst_17 [1] : vector<8x8xf32> to vector<8xf32>
    %26 = vector.shape_cast %25 : vector<8xf32> to vector<8x1xf32>
    %cst_18 = arith.constant dense<0.000000e+00> : vector<8x8xf32>
    %27 = tpu.matmul %24, %11, %cst_18 {dimension_numbers = #tpu.dot_dimension_numbers<[1], [0], [0], [1], [0, 0, 1, 1], [], []>} : vector<8x8xf32>, vector<8x8xf32>, vector<8x8xf32> -> vector<8x8xf32>
    %28 = tpu.reciprocal %26 : vector<8x1xf32> -> vector<8x1xf32>
    %29 = vector.broadcast %28 : vector<8x1xf32> to vector<8x8xf32>
    %30 = arith.mulf %27, %29 : vector<8x8xf32>
    %c0_19 = arith.constant 0 : index
    %c0_20 = arith.constant 0 : index
    %31 = vector.load %arg11[%c0_19, %c0_20] : memref<8x32xf32, #tpu.memory_space<vmem>>, vector<8x8xf32>
    tpu.vector_store %arg11[%c0_19, %c0_20], %30 {strides = array<i32>} : memref<8x32xf32, #tpu.memory_space<vmem>>, vector<8x8xf32>,
    %32 = vector.extract_strided_slice %6 {offsets = [0, 8], sizes = [8, 8], strides = [1, 1]} : vector<8x96xf32> to vector<8x8xf32>
    %33 = vector.extract_strided_slice %6 {offsets = [0, 40], sizes = [8, 8], strides = [1, 1]} : vector<8x96xf32> to vector<8x8xf32>
    %34 = vector.extract_strided_slice %6 {offsets = [0, 72], sizes = [8, 8], strides = [1, 1]} : vector<8x96xf32> to vector<8x8xf32>
    %cst_21 = arith.constant dense<0.000000e+00> : vector<8x8xf32>
    %35 = tpu.matmul %32, %33, %cst_21 {dimension_numbers = #tpu.dot_dimension_numbers<[1], [1], [0], [0], [0, 0, 1, 0], [], []>} : vector<8x8xf32>, vector<8x8xf32>, vector<8x8xf32> -> vector<8x8xf32>
    %cst_22 = arith.constant 0.353553385 : f32
    %36 = vector.broadcast %cst_22 : f32 to vector<8x8xf32>
    %37 = arith.mulf %35, %36 : vector<8x8xf32>
    %38 = vector.broadcast %8 : vector<1x8xf32> to vector<8x8xf32>
    %39 = arith.addf %37, %38 : vector<8x8xf32>
    %c0_23 = arith.constant 0 : index
    %c1 = arith.constant 1 : index
    %c0_24 = arith.constant 0 : index
    %c0_25 = arith.constant 0 : index
    %40 = vector.load %arg10[%c0_23, %c1, %c0_24, %c0_25] : memref<1x4x8x8xf32, #tpu.memory_space<vmem>>, vector<1x1x8x8xf32>
    %41 = vector.shape_cast %40 : vector<1x1x8x8xf32> to vector<8x8xf32>
    %42 = vector.shape_cast %39 : vector<8x8xf32> to vector<1x1x8x8xf32>
    tpu.vector_store %arg10[%c0_23, %c1, %c0_24, %c0_25], %42 {strides = array<i32>} : memref<1x4x8x8xf32, #tpu.memory_space<vmem>>, vector<1x1x8x8xf32>,
    %cst_26 = arith.constant dense<0xFF800000> : vector<8xf32>
    %43 = vector.multi_reduction <maximumf>, %39, %cst_26 [1] : vector<8x8xf32> to vector<8xf32>
    %44 = vector.shape_cast %43 : vector<8xf32> to vector<8x1xf32>
    %45 = vector.broadcast %44 : vector<8x1xf32> to vector<8x8xf32>
    %46 = arith.subf %39, %45 : vector<8x8xf32>
    %47 = math.exp %46 : vector<8x8xf32>
    %cst_27 = arith.constant dense<0.000000e+00> : vector<8xf32>
    %48 = vector.multi_reduction <add>, %47, %cst_27 [1] : vector<8x8xf32> to vector<8xf32>
    %49 = vector.shape_cast %48 : vector<8xf32> to vector<8x1xf32>
    %cst_28 = arith.constant dense<0.000000e+00> : vector<8x8xf32>
    %50 = tpu.matmul %47, %34, %cst_28 {dimension_numbers = #tpu.dot_dimension_numbers<[1], [0], [0], [1], [0, 0, 1, 1], [], []>} : vector<8x8xf32>, vector<8x8xf32>, vector<8x8xf32> -> vector<8x8xf32>
    %51 = tpu.reciprocal %49 : vector<8x1xf32> -> vector<8x1xf32>
    %52 = vector.broadcast %51 : vector<8x1xf32> to vector<8x8xf32>
    %53 = arith.mulf %50, %52 : vector<8x8xf32>
    %c0_29 = arith.constant 0 : index
    %c8 = arith.constant 8 : index
    %54 = vector.load %arg11[%c0_29, %c8] : memref<8x32xf32, #tpu.memory_space<vmem>>, vector<8x8xf32>
    tpu.vector_store %arg11[%c0_29, %c8], %53 {strides = array<i32>} : memref<8x32xf32, #tpu.memory_space<vmem>>, vector<8x8xf32>,
    %55 = vector.extract_strided_slice %6 {offsets = [0, 16], sizes = [8, 8], strides = [1, 1]} : vector<8x96xf32> to vector<8x8xf32>
    %56 = vector.extract_strided_slice %6 {offsets = [0, 48], sizes = [8, 8], strides = [1, 1]} : vector<8x96xf32> to vector<8x8xf32>
    %57 = vector.extract_strided_slice %6 {offsets = [0, 80], sizes = [8, 8], strides = [1, 1]} : vector<8x96xf32> to vector<8x8xf32>
    %cst_30 = arith.constant dense<0.000000e+00> : vector<8x8xf32>
    %58 = tpu.matmul %55, %56, %cst_30 {dimension_numbers = #tpu.dot_dimension_numbers<[1], [1], [0], [0], [0, 0, 1, 0], [], []>} : vector<8x8xf32>, vector<8x8xf32>, vector<8x8xf32> -> vector<8x8xf32>
    %cst_31 = arith.constant 0.353553385 : f32
    %59 = vector.broadcast %cst_31 : f32 to vector<8x8xf32>
    %60 = arith.mulf %58, %59 : vector<8x8xf32>
    %61 = vector.broadcast %8 : vector<1x8xf32> to vector<8x8xf32>
    %62 = arith.addf %60, %61 : vector<8x8xf32>
    %c0_32 = arith.constant 0 : index
    %c2 = arith.constant 2 : index
    %c0_33 = arith.constant 0 : index
    %c0_34 = arith.constant 0 : index
    %63 = vector.load %arg10[%c0_32, %c2, %c0_33, %c0_34] : memref<1x4x8x8xf32, #tpu.memory_space<vmem>>, vector<1x1x8x8xf32>
    %64 = vector.shape_cast %63 : vector<1x1x8x8xf32> to vector<8x8xf32>
    %65 = vector.shape_cast %62 : vector<8x8xf32> to vector<1x1x8x8xf32>
    tpu.vector_store %arg10[%c0_32, %c2, %c0_33, %c0_34], %65 {strides = array<i32>} : memref<1x4x8x8xf32, #tpu.memory_space<vmem>>, vector<1x1x8x8xf32>,
    %cst_35 = arith.constant dense<0xFF800000> : vector<8xf32>
    %66 = vector.multi_reduction <maximumf>, %62, %cst_35 [1] : vector<8x8xf32> to vector<8xf32>
    %67 = vector.shape_cast %66 : vector<8xf32> to vector<8x1xf32>
    %68 = vector.broadcast %67 : vector<8x1xf32> to vector<8x8xf32>
    %69 = arith.subf %62, %68 : vector<8x8xf32>
    %70 = math.exp %69 : vector<8x8xf32>
    %cst_36 = arith.constant dense<0.000000e+00> : vector<8xf32>
    %71 = vector.multi_reduction <add>, %70, %cst_36 [1] : vector<8x8xf32> to vector<8xf32>
    %72 = vector.shape_cast %71 : vector<8xf32> to vector<8x1xf32>
    %cst_37 = arith.constant dense<0.000000e+00> : vector<8x8xf32>
    %73 = tpu.matmul %70, %57, %cst_37 {dimension_numbers = #tpu.dot_dimension_numbers<[1], [0], [0], [1], [0, 0, 1, 1], [], []>} : vector<8x8xf32>, vector<8x8xf32>, vector<8x8xf32> -> vector<8x8xf32>
    %74 = tpu.reciprocal %72 : vector<8x1xf32> -> vector<8x1xf32>
    %75 = vector.broadcast %74 : vector<8x1xf32> to vector<8x8xf32>
    %76 = arith.mulf %73, %75 : vector<8x8xf32>
    %c0_38 = arith.constant 0 : index
    %c16 = arith.constant 16 : index
    %77 = vector.load %arg11[%c0_38, %c16] : memref<8x32xf32, #tpu.memory_space<vmem>>, vector<8x8xf32>
    tpu.vector_store %arg11[%c0_38, %c16], %76 {strides = array<i32>} : memref<8x32xf32, #tpu.memory_space<vmem>>, vector<8x8xf32>,
    %78 = vector.extract_strided_slice %6 {offsets = [0, 24], sizes = [8, 8], strides = [1, 1]} : vector<8x96xf32> to vector<8x8xf32>
    %79 = vector.extract_strided_slice %6 {offsets = [0, 56], sizes = [8, 8], strides = [1, 1]} : vector<8x96xf32> to vector<8x8xf32>
    %80 = vector.extract_strided_slice %6 {offsets = [0, 88], sizes = [8, 8], strides = [1, 1]} : vector<8x96xf32> to vector<8x8xf32>
    %cst_39 = arith.constant dense<0.000000e+00> : vector<8x8xf32>
    %81 = tpu.matmul %78, %79, %cst_39 {dimension_numbers = #tpu.dot_dimension_numbers<[1], [1], [0], [0], [0, 0, 1, 0], [], []>} : vector<8x8xf32>, vector<8x8xf32>, vector<8x8xf32> -> vector<8x8xf32>
    %cst_40 = arith.constant 0.353553385 : f32
    %82 = vector.broadcast %cst_40 : f32 to vector<8x8xf32>
    %83 = arith.mulf %81, %82 : vector<8x8xf32>
    %84 = vector.broadcast %8 : vector<1x8xf32> to vector<8x8xf32>
    %85 = arith.addf %83, %84 : vector<8x8xf32>
    %c0_41 = arith.constant 0 : index
    %c3 = arith.constant 3 : index
    %c0_42 = arith.constant 0 : index
    %c0_43 = arith.constant 0 : index
    %86 = vector.load %arg10[%c0_41, %c3, %c0_42, %c0_43] : memref<1x4x8x8xf32, #tpu.memory_space<vmem>>, vector<1x1x8x8xf32>
    %87 = vector.shape_cast %86 : vector<1x1x8x8xf32> to vector<8x8xf32>
    %88 = vector.shape_cast %85 : vector<8x8xf32> to vector<1x1x8x8xf32>
    tpu.vector_store %arg10[%c0_41, %c3, %c0_42, %c0_43], %88 {strides = array<i32>} : memref<1x4x8x8xf32, #tpu.memory_space<vmem>>, vector<1x1x8x8xf32>,
    %cst_44 = arith.constant dense<0xFF800000> : vector<8xf32>
    %89 = vector.multi_reduction <maximumf>, %85, %cst_44 [1] : vector<8x8xf32> to vector<8xf32>
    %90 = vector.shape_cast %89 : vector<8xf32> to vector<8x1xf32>
    %91 = vector.broadcast %90 : vector<8x1xf32> to vector<8x8xf32>
    %92 = arith.subf %85, %91 : vector<8x8xf32>
    %93 = math.exp %92 : vector<8x8xf32>
    %cst_45 = arith.constant dense<0.000000e+00> : vector<8xf32>
    %94 = vector.multi_reduction <add>, %93, %cst_45 [1] : vector<8x8xf32> to vector<8xf32>
    %95 = vector.shape_cast %94 : vector<8xf32> to vector<8x1xf32>
    %cst_46 = arith.constant dense<0.000000e+00> : vector<8x8xf32>
    %96 = tpu.matmul %93, %80, %cst_46 {dimension_numbers = #tpu.dot_dimension_numbers<[1], [0], [0], [1], [0, 0, 1, 1], [], []>} : vector<8x8xf32>, vector<8x8xf32>, vector<8x8xf32> -> vector<8x8xf32>
    %97 = tpu.reciprocal %95 : vector<8x1xf32> -> vector<8x1xf32>
    %98 = vector.broadcast %97 : vector<8x1xf32> to vector<8x8xf32>
    %99 = arith.mulf %96, %98 : vector<8x8xf32>
    %c0_47 = arith.constant 0 : index
    %c24 = arith.constant 24 : index
    %100 = vector.load %arg11[%c0_47, %c24] : memref<8x32xf32, #tpu.memory_space<vmem>>, vector<8x8xf32>
    tpu.vector_store %arg11[%c0_47, %c24], %99 {strides = array<i32>} : memref<8x32xf32, #tpu.memory_space<vmem>>, vector<8x8xf32>,
    %c0_48 = arith.constant 0 : index
    %c0_49 = arith.constant 0 : index
    %101 = vector.load %arg11[%c0_48, %c0_49] : memref<8x32xf32, #tpu.memory_space<vmem>>, vector<8x32xf32>
    %c0_50 = arith.constant 0 : index
    %c0_51 = arith.constant 0 : index
    %102 = vector.load %arg4[%c0_50, %c0_51] : memref<32x32xf32, #tpu.memory_space<vmem>>, vector<32x32xf32>
    %cst_52 = arith.constant dense<0.000000e+00> : vector<8x32xf32>
    %103 = tpu.matmul %101, %102, %cst_52 {dimension_numbers = #tpu.dot_dimension_numbers<[1], [1], [0], [0], [0, 0, 1, 0], [], []>} : vector<8x32xf32>, vector<32x32xf32>, vector<8x32xf32> -> vector<8x32xf32>
    %c0_53 = arith.constant 0 : index
    %c0_54 = arith.constant 0 : index
    %104 = vector.load %arg6[%c0_53, %c0_54] : memref<1x32xf32, #tpu.memory_space<vmem>>, vector<1x32xf32>
    %105 = vector.broadcast %104 : vector<1x32xf32> to vector<8x32xf32>
    %106 = arith.addf %103, %105 : vector<8x32xf32>
    %107 = arith.addf %106, %1 : vector<8x32xf32>
    %cst_55 = arith.constant dense<0.000000e+00> : vector<8xf32>
    %108 = vector.multi_reduction <add>, %107, %cst_55 [1] : vector<8x32xf32> to vector<8xf32>
    %109 = vector.shape_cast %108 : vector<8xf32> to vector<8x1xf32>
    %cst_56 = arith.constant 3.200000e+01 : f32
    %110 = vector.broadcast %cst_56 : f32 to vector<8x1xf32>
    %111 = arith.divf %109, %110 : vector<8x1xf32>
    %112 = vector.broadcast %111 : vector<8x1xf32> to vector<8x32xf32>
    %113 = arith.subf %107, %112 : vector<8x32xf32>
    %114 = arith.mulf %113, %113 : vector<8x32xf32>
    %cst_57 = arith.constant dense<0.000000e+00> : vector<8xf32>
    %115 = vector.multi_reduction <add>, %114, %cst_57 [1] : vector<8x32xf32> to vector<8xf32>
    %116 = vector.shape_cast %115 : vector<8xf32> to vector<8x1xf32>
    %cst_58 = arith.constant 3.200000e+01 : f32
    %117 = vector.broadcast %cst_58 : f32 to vector<8x1xf32>
    %118 = arith.divf %116, %117 : vector<8x1xf32>
    %cst_59 = arith.constant 9.99999996E-13 : f32
    %119 = vector.broadcast %cst_59 : f32 to vector<8x1xf32>
    %120 = arith.addf %118, %119 : vector<8x1xf32>
    %121 = math.rsqrt %120 : vector<8x1xf32>
    %122 = vector.broadcast %121 : vector<8x1xf32> to vector<8x32xf32>
    %123 = arith.mulf %113, %122 : vector<8x32xf32>
    %c0_60 = arith.constant 0 : index
    %c0_61 = arith.constant 0 : index
    %124 = vector.load %arg7[%c0_60, %c0_61] : memref<1x32xf32, #tpu.memory_space<vmem>>, vector<1x32xf32>
    %125 = vector.broadcast %124 : vector<1x32xf32> to vector<8x32xf32>
    %126 = arith.mulf %123, %125 : vector<8x32xf32>
    %c0_62 = arith.constant 0 : index
    %c0_63 = arith.constant 0 : index
    %127 = vector.load %arg8[%c0_62, %c0_63] : memref<1x32xf32, #tpu.memory_space<vmem>>, vector<1x32xf32>
    %128 = vector.broadcast %127 : vector<1x32xf32> to vector<8x32xf32>
    %129 = arith.addf %126, %128 : vector<8x32xf32>
    %130 = vector.shape_cast %129 : vector<8x32xf32> to vector<1x8x32xf32>
    %c0_64 = arith.constant 0 : index
    %c0_65 = arith.constant 0 : index
    %c0_66 = arith.constant 0 : index
    %131 = vector.load %arg9[%c0_64, %c0_65, %c0_66] : memref<1x8x32xf32, #tpu.memory_space<vmem>>, vector<1x8x32xf32>
    tpu.vector_store %arg9[%c0_64, %c0_65, %c0_66], %130 {strides = array<i32>} : memref<1x8x32xf32, #tpu.memory_space<vmem>>, vector<1x8x32xf32>,
    return
  }
  func.func @transform_0(%arg0: i32) -> (i32, i32, i32) {
    %c0_i32 = arith.constant 0 : i32
    %c0_i32_0 = arith.constant 0 : i32
    %c0_i32_1 = arith.constant 0 : i32
    return %arg0, %c0_i32, %c0_i32_0 : i32, i32, i32
  }
  func.func @transform_1(%arg0: i32) -> (i32, i32, i32, i32) {
    %c0_i32 = arith.constant 0 : i32
    %c0_i32_0 = arith.constant 0 : i32
    %c0_i32_1 = arith.constant 0 : i32
    %c0_i32_2 = arith.constant 0 : i32
    return %arg0, %c0_i32, %c0_i32_0, %c0_i32_1 : i32, i32, i32, i32
  }
  func.func @transform_2(%arg0: i32) -> (i32, i32) {
    %c0_i32 = arith.constant 0 : i32
    %c0_i32_0 = arith.constant 0 : i32
    %c0_i32_1 = arith.constant 0 : i32
    return %c0_i32, %c0_i32_0 : i32, i32
  }
  func.func @transform_3(%arg0: i32) -> (i32, i32) {
    %c0_i32 = arith.constant 0 : i32
    %c0_i32_0 = arith.constant 0 : i32
    %c0_i32_1 = arith.constant 0 : i32
    return %c0_i32, %c0_i32_0 : i32, i32
  }
  func.func @transform_4(%arg0: i32) -> (i32, i32) {
    %c0_i32 = arith.constant 0 : i32
    %c0_i32_0 = arith.constant 0 : i32
    %c0_i32_1 = arith.constant 0 : i32
    return %c0_i32, %c0_i32_0 : i32, i32
  }
  func.func @transform_5(%arg0: i32) -> (i32, i32) {
    %c0_i32 = arith.constant 0 : i32
    %c0_i32_0 = arith.constant 0 : i32
    %c0_i32_1 = arith.constant 0 : i32
    return %c0_i32, %c0_i32_0 : i32, i32
  }
  func.func @transform_6(%arg0: i32) -> (i32, i32) {
    %c0_i32 = arith.constant 0 : i32
    %c0_i32_0 = arith.constant 0 : i32
    %c0_i32_1 = arith.constant 0 : i32
    return %c0_i32, %c0_i32_0 : i32, i32
  }
  func.func @transform_7(%arg0: i32) -> (i32, i32) {
    %c0_i32 = arith.constant 0 : i32
    %c0_i32_0 = arith.constant 0 : i32
    %c0_i32_1 = arith.constant 0 : i32
    return %c0_i32, %c0_i32_0 : i32, i32
  }
  func.func @transform_8(%arg0: i32) -> (i32, i32, i32) {
    %c0_i32 = arith.constant 0 : i32
    %c0_i32_0 = arith.constant 0 : i32
    %c0_i32_1 = arith.constant 0 : i32
    return %arg0, %c0_i32, %c0_i32_0 : i32, i32, i32
  }
  func.func @transform_9(%arg0: i32) -> (i32, i32, i32, i32) {
    %c0_i32 = arith.constant 0 : i32
    %c0_i32_0 = arith.constant 0 : i32
    %c0_i32_1 = arith.constant 0 : i32
    %c0_i32_2 = arith.constant 0 : i32
    return %arg0, %c0_i32, %c0_i32_0, %c0_i32_1 : i32, i32, i32, i32
  }
}

</mosaic_0001>

<bundles_post_ra>
// kernel: tpu_custom_call.1
= control target key start
LH: loop header
LB: loop body
LE: loop exit
PB: predicated region body
PF: predicated region fallthrough
CT: control target
= control target key end

     0   :  { %s2223_s0 = inlined_call_operand.vmem [shape: f32[2,8,32], index: 0, kind: input, shape index: {}]   ;;  %s2224_s1 = inlined_call_operand.vmem [shape: f32[2,1,1,8], index: 1, kind: input, shape index: {}]   ;;  %s2225_s2 = inlined_call_operand.vmem [shape: f32[96,32], index: 2, kind: input, shape index: {}]   ;;  %s2226_s3 = inlined_call_operand.vmem [shape: f32[32,32], index: 3, kind: input, shape index: {}]   ;;  %s2227_s4 = inlined_call_operand.vmem [shape: f32[1,96], index: 4, kind: input, shape index: {}]   ;;  %s2228_s5 = inlined_call_operand.vmem [shape: f32[1,32], index: 5, kind: input, shape index: {}]   ;;  %s2229_s6 = inlined_call_operand.vmem [shape: f32[1,32], index: 6, kind: input, shape index: {}]   ;;  %s2230_s7 = inlined_call_operand.vmem [shape: f32[1,32], index: 7, kind: input, shape index: {}]   ;;  %s2231_s8 = inlined_call_operand.hbm [shape: f32[2,8,32], index: 8, kind: output, shape index: {0}]   ;;  %s2232_s9 = inlined_call_operand.hbm [shape: f32[2,4,8,8], index: 9, kind: output, shape index: {1}]  }
   0x1   :  { %2233 = sst [smem:[#allocation9_spill]] %s2223_s0 }
   0x2   :  { %15 = vsyncpa [#allocation4], 0 }
   0x3   :  { %17 = vsyncpa [#allocation4 + $0x1], 0 }
   0x4   :  { %18 = vsyncpa [#allocation6], 0 }
   0x5   :  { %20 = vsyncpa [#allocation6 + $0x1], 0  ;;  %s1891_s30 = smov 0   ;;  %s1893_s10 = smov 0  }
   0x6   :  { %s1895_s11 = smov 0   ;;  %s1897_s12 = smov 0  }
   0x7 LB: > { %s1912_s13 = sadd.s32 4294967295, %s1819_s12   ;;  %s1448_s14 = sadd.s32 4294967294, %s1819_s12   ;;  %s1819_s12 = sphi %s1897_s12, %s2243_s12   ;;  %s1815_s11 = sphi %s1895_s11, %s2242_s11   ;;  %s1811_s10 = sphi %s1893_s10, %s2241_s10   ;;  %s1807_s30 = sphi %s1891_s30, %s2240_s30  }
   0x8   : > { %s1916_s15 = sadd.s32 1, %s1819_s12   ;;  %s211_s16 = sadd.s32 1, %s1815_s11 }
   0x9   : > { %s208_s17 = ssub.s32 %s1819_s12, %s1916_s15  ;;  %p221_p0 = scmp.ne.s32.totalorder %s1815_s11, %s1811_s10 }
   0xa   : > { %p209_p1 = scmp.eq.s32.totalorder %s208_s17, 0  ;;  %p222_p2 = scmp.eq.s32.totalorder %s1912_s13, 1 }
   0xb   : > { %p227_p3 = scmp.ne.s32.totalorder %s1811_s10, %s1807_s30  ;;  %p228_p4 = scmp.eq.s32.totalorder %s1448_s14, 1 }
   0xc   : > { %s1927_s18 = scalar_select %p209_p1, %s1815_s11, %s211_s16  }
   0xd   : > { %p1929_p5 = por %p222_p2, %p221_p0  ;;  %p1933_p6 = por %p228_p4, %p227_p3 }
   0xe   : > { %p1451_p7 = scmp.ge.s32.totalorder %s1819_s12, 1  ;;  %p303_p8 = scmp.lt.s32.totalorder %s1819_s12, 3 }
  0x10   : > { %p304_p9 = pnand %p1451_p7, %p303_p8 }
  0x11   : > { %v354_v0 = vld [vmem:[%s2225_s2] sm:$0xff] (!%p304_p9)  ;;  %v355_v1 = vld [vmem:[%s2225_s2 + $0x8] sm:$0xff] (!%p304_p9)  ;;  %vm373_vm0 = vcmask (!%p304_p9), 261120   ;;  %v1821_v2 = vmov (!%p304_p9), 0.0|0.0   ;;  %vm1822_vm2 = vmmov (!%p304_p9), 0   ;;  %v1823_v5 = vmov (!%p304_p9), 0.0  }
  0x12   : > { %307 = sbr.rel (%p304_p9) target bundleno = 2787 (0xae3), region = 52  ;;  %1613 = vmatprep.subr.bf16.mxu0 (!%p304_p9), %v1821_v2  ;;  %v1614_v3 = vpack.c.bf16 (!%p304_p9), %v355_v1, %v354_v0  ;;  %vm1948_vm1 = vmpackc.low (!%p304_p9), %vm373_vm0, %vm373_vm0  ;;  %1559 = vmatprep.mubr.msk.f32.mxu0 (!%p304_p9), %vm1822_vm2, %v1823_v5  ;;  %v356_v6 = vld [vmem:[%s2225_s2 + $0x10] sm:$0xff] (!%p304_p9)  ;;  %v357_v7 = vld [vmem:[%s2225_s2 + $0x18] sm:$0xff] (!%p304_p9)  ;;  %p346_p10 = scmp.lt.s32.totalorder (!%p304_p9), %s1912_s13, 1  ;;  %vm487_vm3 = vcmask (!%p304_p9), 64512   ;;  %vm832_vm4 = vcmask (!%p304_p9), 130112  }
  0x13   : > { %1562 = vmatprep.subr.mxu1 (!%p304_p9), %v1823_v5  ;;  %1564 = vmatprep.mubr.msk.f32.mxu1 (!%p304_p9), %vm1822_vm2, %v1823_v5  ;;  %v1618_v8 = vpack.c.bf16 (!%p304_p9), %v357_v7, %v356_v6  ;;  %v358_v9 = vld [vmem:[%s2225_s2 + $0x20] sm:$0xff] (!%p304_p9)  ;;  %v359_v10 = vld [vmem:[%s2225_s2 + $0x28] sm:$0xff] (!%p304_p9)  ;;  %v360_v12 = vld [vmem:[%s2225_s2 + $0x30] sm:$0xff] (!%p304_p9)  ;;  %s2238_s0 = sld [smem:[#allocation9_spill]] (!%p304_p9)  ;;  %s1824_s28 = smov (!%p304_p9), 64   ;;  %vm1007_vm5 = vcmask (!%p304_p9), 195712  }
  0x14   : > { %1616 = vmatpush3.bf16.xpose.msk.msra.mxu0 (!%p304_p9), %vm1948_vm1, %v1614_v3  ;;  %v1622_v11 = vpack.c.bf16 (!%p304_p9), %v359_v10, %v358_v9  ;;  %v361_v13 = vld [vmem:[%s2225_s2 + $0x38] sm:$0xff] (!%p304_p9)  ;;  %v362_v15 = vld [vmem:[%s2225_s2 + $0x40] sm:$0xff] (!%p304_p9)  ;;  %v363_v16 = vld [vmem:[%s2225_s2 + $0x48] sm:$0xff] (!%p304_p9)  ;;  %s1825_s29 = smov (!%p304_p9), 96   ;;  %s1826_s14 = smov (!%p304_p9), 88   ;;  %vm1182_vm6 = vcmask (!%p304_p9), 261312  }
  0x15   : > { %1617 = vmatprep.subr.bf16.mxu0 (!%p304_p9), %v1821_v2  ;;  %v1626_v14 = vpack.c.bf16 (!%p304_p9), %v361_v13, %v360_v12  ;;  %v1630_v17 = vpack.c.bf16 (!%p304_p9), %v363_v16, %v362_v15  ;;  %v364_v18 = vld [vmem:[%s2225_s2 + $0x50] sm:$0xff] (!%p304_p9)  ;;  %v365_v19 = vld [vmem:[%s2225_s2 + $0x58] sm:$0xff] (!%p304_p9)  ;;  %v1455_v22 = vld [vmem:[%s2227_s4] ss:$0 sm:$0xff] (!%p304_p9)  ;;  %s1827_s16 = smov (!%p304_p9), 120   ;;  %s2033_s17 = sand.u32 (!%p304_p9), 1, %s1811_s10  }
  0x16   : > { %v1634_v20 = vpack.c.bf16 (!%p304_p9), %v365_v19, %v364_v18  ;;  %s1828_s27 = smov (!%p304_p9), 56   ;;  %s1835_s23 = smov (!%p304_p9), 8  }
  0x19   : > { %s2004_s21 = scalar_select %p346_p10, %s1912_s13, 1 }
  0x1b   : > { %s1454_s22 = sshll.u32 %s2004_s21, 3  ;;  %s352_s24 = scalar_lea.vmem %s2224_s1, %s2004_s21 }
  0x1c   : > { %1620 = vmatpush3.bf16.xpose.msk.msra.mxu0 %vm1948_vm1, %v1618_v8  ;;  %s349_s25 = scalar_lea.vmem %s2238_s0, %s1454_s22  ;;  %v2040_v28 = vld [vmem:[%s352_s24] ss:$0 sm:$0xff]  ;;  %s1829_s21 = smov 112  }
  0x1d   : > { %1621 = vmatprep.subr.bf16.mxu0 %v1821_v2  ;;  %v2012_v21 = vld [vmem:[%s349_s25] sm:$0xff]  ;;  %s1453_s25 = sshll.u32 %s2033_s17, 5  ;;  %s1834_s22 = smov 40  }
  0x1e   : > { %s2043_s26 = scalar_lea.vmem [#allocation5], %s1453_s25  ;;  %s1836_s24 = smov 16  }
  0x1f   : > { %s1838_s25 = smov [#allocation5]  }
  0x24   : > { %1624 = vmatpush3.bf16.xpose.msk.msra.mxu0 %vm1948_vm1, %v1622_v11 }
  0x25   : > { %1625 = vmatprep.subr.bf16.mxu0 %v1821_v2 }
  0x2c   : > { %1628 = vmatpush3.bf16.xpose.msk.msra.mxu0 %vm1948_vm1, %v1626_v14 }
  0x2d   : > { %1629 = vmatprep.subr.bf16.mxu0 %v1821_v2 }
  0x34   : > { %1632 = vmatpush3.bf16.xpose.msk.msra.mxu0 %vm1948_vm1, %v1630_v17 }
  0x35   : > { %1633 = vmatprep.subr.bf16.mxu0 %v1821_v2 }
  0x3c   : > { %1636 = vmatpush3.bf16.xpose.msk.msra.mxu0 %vm1948_vm1, %v1634_v20 }
  0x43   : > { %1560 = vmatmul.mubr.msk.f32.vlgmr.msra.gmra.mrb[0].mxu0 %vm373_vm0, %v2012_v21 }
 0x116   : > { %v479_v23 = vpop.f32.mrb[0].mxu0 }
 0x117   : > { %v2019_v24 = vadd.f32 %v1455_v22, %v479_v23  ;;  %v1561_v25 = vpop.f32.mrb[1].mxu0 }
 0x119   : > { %580 = vrot.lane.b32.xlu1 %v2019_v24, %s1824_s28  ;;  %485 = vrot.lane.b32.xlu0 %v2019_v24, %s1825_s29  ;;  %s1830_s28 = smov 80   ;;  %s1831_s29 = smov 48  }
 0x11d   : > { %661 = vrot.lane.b32.xlu1 %v2019_v24, %s1826_s14  ;;  %s1832_s14 = smov 72  }
 0x121   : > { %659 = vrot.lane.b32.xlu1 %v2019_v24, %s1827_s16  ;;  %s1833_s16 = smov 104  }
 0x18b   : > { %v486_v26 = vpop.permute.xlu0 %485  ;;  %v581_v27 = vpop.permute.xlu1 %580 }
 0x18c   : > { %1563 = vmatpush3.xpose.msk.msra.mxu1 %vm487_vm3, %v486_v26 }
 0x18d   : > { %1567 = vmatprep.subr.mxu1 %v1823_v5 }
 0x18f   : > { %1565 = vmatmul.mubr.msk.f32.vlgmr.msra.gmra.mrb[0].mxu1 %vm487_vm3, %v2019_v24  ;;  %v662_v37 = vpop.permute.xlu1 %661 }
 0x190   : > { %1568 = vmatpush3.msra.mxu1 %v581_v27  ;;  %1569 = vmatprep.mubr.msk.f32.mxu1 %vm1822_vm2, %v1823_v5 }
 0x191   : > { %1572 = vmatprep.subr.mxu1 %v1823_v5 }
 0x193   : > { %v660_v39 = vpop.permute.xlu1 %659 }
 0x262   : > { %v558_v29 = vpop.f32.mrb[0].mxu1 }
 0x263   : > { %v562_v30 = vmul.f32 0.35355338, %v558_v29  ;;  %v1566_v31 = vpop.f32.mrb[1].mxu1 }
 0x265   : > { %v569_v32 = vadd.f32 %v2040_v28, %v562_v30  ;;  %v1186_v30 = vld [vmem:[%s2226_s3 + $0x8] sm:$0xff] }
 0x267   : > { %570 = vst.msk [vmem:[%s2043_s26] sm:$0xff] %vm487_vm3, %v569_v32  ;;  %v571_v33 = vsel %vm487_vm3, %v569_v32, -inf }
 0x268   : > { %572 = vmax.xlane.f32.xlu0 %v571_v33 }
 0x27e   : > { %750 = vrot.lane.b32.xlu0 %v2019_v24, %s1828_s27  ;;  %s1729_s27 = sshll.u32 %s1838_s25, 4  ;;  %s1730_s27 = int_to_ptr.vmem [resolvable:$false] %s1729_s27 }
 0x282   : > { %834 = vrot.lane.b32.xlu0 %v2019_v24, %s1829_s21  ;;  %s1345_s21 = sshll.u32 %s2043_s26, 4  ;;  %s2136_s21 = int_to_ptr.vmem [resolvable:$true] %s1345_s21 }
 0x283   : > { %p1732_p0 = scmp.lt.s32.totalorder %s2136_s21, %s1730_s27 }
 0x2f5   : > { %v573_v34 = vpop.xlane.xlu0 %572 }
 0x2f6   : > { %v574_v35 = vsub.f32 %v569_v32, %v573_v34 }
 0x2f8   : > { %v575_v36 = vmul.f32 1.442695, %v574_v35 }
 0x2f9   : > { %v751_v40 = vpop.permute.xlu0 %750 }
 0x2fa   : > { %1707 = vpow2.f32 %v575_v36 }
 0x2fd   : > { %v835_v53 = vpop.permute.xlu0 %834 }
 0x304   : > { %v2050_v38 = vpop.eup %1707 }
 0x305   : > { %1570 = vmatmul.mubr.msk.f32.vlgmr.msra.gmra.mrb[2].mxu1 %vm487_vm3, %v2050_v38 }
 0x306   : > { %1573 = vmatpush3.xpose.msk.msra.mxu1 %vm487_vm3, %v662_v37  ;;  %1574 = vmatprep.mubr.msk.f32.mxu1 %vm1822_vm2, %v1823_v5 }
 0x307   : > { %1577 = vmatprep.subr.mxu1 %v1823_v5 }
 0x309   : > { %1575 = vmatmul.mubr.msk.f32.vlgmr.msra.gmra.mrb[4].mxu1 %vm487_vm3, %v660_v39 }
 0x30a   : > { %1578 = vmatpush3.msra.mxu1 %v751_v40  ;;  %1579 = vmatprep.mubr.msk.f32.mxu1 %vm1822_vm2, %v1823_v5 }
 0x30b   : > { %1582 = vmatprep.subr.mxu1 %v1823_v5 }
 0x3d8   : > { %v2062_v41 = vpop.f32.mrb[2].mxu1 }
 0x3d9   : > { %v1571_v42 = vpop.f32.mrb[3].mxu1 }
 0x3dc   : > { %v733_v43 = vpop.f32.mrb[4].mxu1 }
 0x3dd   : > { %v737_v44 = vmul.f32 0.35355338, %v733_v43  ;;  %v1576_v45 = vpop.f32.mrb[5].mxu1 }
 0x3df   : > { %v738_v46 = vadd.f32 %v2040_v28, %v737_v44 }
 0x3e1   : > { %1475 = vst.msk [vmem:[%s2043_s26 + $0x8] sm:$0xff] %vm487_vm3, %v738_v46  ;;  %v741_v47 = vsel %vm487_vm3, %v738_v46, -inf }
 0x3e2   : > { %742 = vmax.xlane.f32.xlu1 %v741_v47 }
 0x3f3   : > { %836 = vrot.lane.b32.xlu1 %v2019_v24, %s1830_s28  ;;  %s1500_s28 = sshll.u32 %s1912_s13, 9 }
 0x3f7   : > { %925 = vrot.lane.b32.xlu1 %v2019_v24, %s1831_s29 }
 0x3fb   : > { %1011 = vrot.lane.b32.xlu1 %v2019_v24, %s1832_s14 }
 0x3ff   : > { %1009 = vrot.lane.b32.xlu1 %v2019_v24, %s1833_s16  ;;  %s2141_s16 = scalar_lea.hbm %s2232_s9, %s1500_s28 }
 0x46f   : > { %v743_v48 = vpop.xlane.xlu1 %742 }
 0x470   : > { %v744_v49 = vsub.f32 %v738_v46, %v743_v48  ;;  %v1485_v46 = vld [vmem:[%s2228_s5] ss:$0 sm:$0xff] }
 0x472   : > { %v745_v50 = vmul.f32 1.442695, %v744_v49 }
 0x473   : > { %v837_v51 = vpop.permute.xlu1 %836 }
 0x474   : > { %1709 = vpow2.f32 %v745_v50 }
 0x477   : > { %v926_v54 = vpop.permute.xlu1 %925 }
 0x47b   : > { %v1012_v1 = vpop.permute.xlu1 %1011 }
 0x47e   : > { %v1710_v52 = vpop.eup %1709 }
 0x47f   : > { %1580 = vmatmul.mubr.msk.f32.vlgmr.msra.gmra.mrb[6].mxu1 %vm487_vm3, %v1710_v52  ;;  %v1010_v7 = vpop.permute.xlu1 %1009  ;;  %v747_v16 = vsel %vm487_vm3, %v1710_v52, 0.0 }
 0x480   : > { %1583 = vmatpush3.xpose.msk.msra.mxu1 %vm487_vm3, %v837_v51  ;;  %1584 = vmatprep.mubr.msk.f32.mxu1 %vm1822_vm2, %v1823_v5 }
 0x481   : > { %1587 = vmatprep.subr.mxu1 %v1823_v5 }
 0x483   : > { %1585 = vmatmul.mubr.msk.f32.vlgmr.msra.gmra.mrb[8].mxu1 %vm487_vm3, %v835_v53 }
 0x484   : > { %1588 = vmatpush3.msra.mxu1 %v926_v54  ;;  %1589 = vmatprep.mubr.msk.f32.mxu1 %vm1822_vm2, %v1823_v5 }
 0x485   : > { %1592 = vmatprep.subr.mxu1 %v1823_v5 }
 0x552   : > { %v822_v55 = vpop.f32.mrb[6].mxu1 }
 0x553   : > { %v1581_v56 = vpop.f32.mrb[7].mxu1 }
 0x556   : > { %v908_v57 = vpop.f32.mrb[8].mxu1 }
 0x557   : > { %v912_v58 = vmul.f32 0.35355338, %v908_v57  ;;  %v1586_v59 = vpop.f32.mrb[9].mxu1 }
 0x559   : > { %v913_v60 = vadd.f32 %v2040_v28, %v912_v58 }
 0x55b   : > { %1479 = vst.msk [vmem:[%s2043_s26 + $0x10] sm:$0xff] %vm487_vm3, %v913_v60  ;;  %v916_v61 = vsel %vm487_vm3, %v913_v60, -inf }
 0x55c   : > { %917 = vmax.xlane.f32.xlu0 %v916_v61 }
 0x572   : > { %1100 = vrot.lane.b32.xlu0 %v2019_v24, %s1834_s22  ;;  %v577_v24 = vsel %vm487_vm3, %v2050_v38, 0.0  ;;  %v1187_v38 = vld [vmem:[%s2226_s3 + $0x10] sm:$0xff] }
 0x5e9   : > { %v918_v62 = vpop.xlane.xlu0 %917 }
 0x5ea   : > { %v919_v63 = vsub.f32 %v913_v60, %v918_v62 }
 0x5ec   : > { %v920_v0 = vmul.f32 1.442695, %v919_v63 }
 0x5ed   : > { %v1101_v8 = vpop.permute.xlu0 %1100 }
 0x5ee   : > { %1711 = vpow2.f32 %v920_v0 }
 0x5f8   : > { %v1712_v3 = vpop.eup %1711 }
 0x5f9   : > { %1590 = vmatmul.mubr.msk.f32.vlgmr.msra.gmra.mrb[10].mxu1 %vm487_vm3, %v1712_v3  ;;  %v922_v6 = vsel %vm487_vm3, %v1712_v3, 0.0 }
 0x5fa   : > { %1593 = vmatpush3.xpose.msk.msra.mxu1 %vm487_vm3, %v1012_v1  ;;  %923 = vadd.xlane.f32.xlu0 %v922_v6 }
 0x5fb   : > { %1594 = vmatprep.mubr.msk.f32.mxu1 %vm1822_vm2, %v1823_v5  ;;  %1597 = vmatprep.subr.mxu1 %v1823_v5 }
 0x5fd   : > { %1595 = vmatmul.mubr.msk.f32.vlgmr.msra.gmra.mrb[12].mxu1 %vm487_vm3, %v1010_v7 }
 0x5fe   : > { %1598 = vmatpush3.msra.mxu1 %v1101_v8  ;;  %1599 = vmatprep.mubr.msk.f32.mxu1 %vm1822_vm2, %v1823_v5 }
 0x5ff   : > { %1637 = vmatprep.subr.bf16.mxu1 %v1821_v2 }
 0x687   : > { %v924_v25 = vpop.xlane.xlu0 %923 }
 0x6cc   : > { %v997_v9 = vpop.f32.mrb[10].mxu1 }
 0x6cd   : > { %v1591_v10 = vpop.f32.mrb[11].mxu1 }
 0x6d0   : > { %v1083_v11 = vpop.f32.mrb[12].mxu1 }
 0x6d1   : > { %v1087_v12 = vmul.f32 0.35355338, %v1083_v11  ;;  %v1596_v13 = vpop.f32.mrb[13].mxu1 }
 0x6d3   : > { %v1088_v14 = vadd.f32 %v2040_v28, %v1087_v12 }
 0x6d5   : > { %1483 = vst.msk [vmem:[%s2043_s26 + $0x18] sm:$0xff] %vm487_vm3, %v1088_v14  ;;  %v1091_v15 = vsel %vm487_vm3, %v1088_v14, -inf  ;;  %s1731_s26 = scalar_lea.vmem %s1730_s27, 1024 }
 0x6d6   : > { %1092 = vmax.xlane.f32.xlu1 %v1091_v15 }
 0x6da   : > { %748 = vadd.xlane.f32.xlu1 %v747_v16 }
 0x763   : > { %v1093_v17 = vpop.xlane.xlu1 %1092 }
 0x764   : > { %v1094_v18 = vsub.f32 %v1088_v14, %v1093_v17 }
 0x766   : > { %v1095_v19 = vmul.f32 1.442695, %v1094_v18 }
 0x767   : > { %v749_v23 = vpop.xlane.xlu1 %748 }
 0x768   : > { %1713 = vpow2.f32 %v1095_v19 }
 0x769   : > { %1715 = vrcp.f32 %v749_v23 }
 0x76a   : > { %1717 = vrcp.f32 %v924_v25 }
 0x772   : > { %v1714_v20 = vpop.eup %1713 }
 0x773   : > { %1600 = vmatmul.mubr.msk.f32.vlgmr.msra.gmra.mrb[14].mxu1 %vm487_vm3, %v1714_v20  ;;  %v1097_v22 = vsel %vm487_vm3, %v1714_v20, 0.0  ;;  %v1716_v26 = vpop.eup %1715 }
 0x774   : > { %1098 = vadd.xlane.f32.xlu1 %v1097_v22  ;;  %1610 = vmatprep.mubr.msk.f32.mxu1 %vm1822_vm2, %v1823_v5  ;;  %v827_v27 = vmul.f32 %v1716_v26, %v822_v55  ;;  %v1718_v28 = vpop.eup %1717  ;;  %v1185_v5 = vld [vmem:[%s2226_s3] sm:$0xff] }
 0x775   : > { %v1002_v29 = vmul.f32 %v1718_v28, %v997_v9  ;;  %v1638_v31 = vpack.c.bf16 %v1186_v30, %v1185_v5 }
 0x777   : > { %1640 = vmatpush3.bf16.xpose.msk.msra.mxu1 %vm1948_vm1, %v1638_v31 }
 0x778   : > { %578 = vadd.xlane.f32.xlu1 %v577_v24  ;;  %1641 = vmatprep.subr.bf16.mxu1 %v1821_v2  ;;  %v1188_v2 = vld [vmem:[%s2226_s3 + $0x18] sm:$0xff] }
 0x779   : > { %v1642_v39 = vpack.c.bf16 %v1188_v2, %v1187_v38 }
 0x77f   : > { %1644 = vmatpush3.bf16.xpose.msk.msra.mxu1 %vm1948_vm1, %v1642_v39 }
 0x789   : > { %829 = vrot.lane.b32.xlu1 %v827_v27, %s1835_s23 }
 0x78d   : > { %1004 = vrot.lane.b32.xlu1 %v1002_v29, %s1836_s24  ;;  %s1837_s24 = smov 24  }
 0x801   : > { %v1099_v32 = vpop.xlane.xlu1 %1098 }
 0x805   : > { %v579_v33 = vpop.xlane.xlu1 %578 }
 0x806   : > { %1719 = vrcp.f32 %v579_v33 }
 0x807   : > { %1721 = vrcp.f32 %v1099_v32 }
 0x809   : > { %v830_v34 = vpop.permute.xlu1 %829 }
 0x80d   : > { %v1005_v37 = vpop.permute.xlu1 %1004 }
 0x810   : > { %v1720_v35 = vpop.eup %1719 }
 0x811   : > { %v657_v36 = vmul.f32 %v1720_v35, %v2062_v41  ;;  %v1722_v40 = vpop.eup %1721 }
 0x813   : > { %658 = vst.msk [vmem:[#allocation2] sm:$0xff] %vm487_vm3, %v657_v36 }
 0x814   : > { %833 = vst.msk [vmem:[#allocation2] sm:$0xff] %vm832_vm4, %v830_v34 }
 0x815   : > { %1008 = vst.msk [vmem:[#allocation2] sm:$0xff] %vm1007_vm5, %v1005_v37 }
 0x846   : > { %v1172_v41 = vpop.f32.mrb[14].mxu1 }
 0x847   : > { %v1177_v42 = vmul.f32 %v1722_v40, %v1172_v41  ;;  %v1601_v43 = vpop.f32.mrb[15].mxu1 }
 0x849   : > { %1179 = vrot.lane.b32.xlu0 %v1177_v42, %s1837_s24  ;;  %s1725_s24 = scalar_lea.vmem %s2136_s21, 512 }
 0x84a   : > { %p1726_p11 = scmp.ne.s32.totalorder %s2136_s21, %s1725_s24  ;;  %p1733_p1 = scmp.lt.s32.totalorder %s1731_s26, %s1725_s24 }
 0x84c   : > { %p1727_p12 = pnand %p1726_p11, %p1929_p5  ;;  %p1734_p2 = por %p1733_p1, %p1732_p0 }
 0x84e   : > { %p1728_p13 = pneg %p1727_p12 }
 0x850   : > { %p1735_p3 = pnand %p1734_p2, %p1728_p13 }
 0x8bb   : > { %v1180_v44 = vpop.permute.xlu0 %1179 }
 0x8bc   : > { %1183 = vst.msk [vmem:[#allocation2] sm:$0xff] %vm1182_vm6, %v1180_v44 }
 0x8c3   : > { %v1184_v45 = vld [vmem:[#allocation2] sm:$0xff] }
 0x8c4   : > { %1611 = vmatmul.mubr.msk.f32.vlgmr.msra.gmra.mrb[16].mxu1 %vm373_vm0, %v1184_v45 }
 0x997   : > { %v1277_v4 = vpop.f32.mrb[16].mxu1 }
 0x998   : > { %v1278_v47 = vadd.f32 %v1485_v46, %v1277_v4  ;;  %v1612_v48 = vpop.f32.mrb[17].mxu1 }
 0x99a   : > { %v1281_v49 = vadd.f32 %v1278_v47, %v2012_v21 }
 0x99c   : > { %v1282_v50 = vsel %vm373_vm0, %v1281_v49, 0.0 }
 0x99d   : > { %1283 = vadd.xlane.f32.xlu1 %v1282_v50 }
 0xa2a   : > { %v1284_v51 = vpop.xlane.xlu1 %1283 }
 0xa2b   : > { %v1286_v52 = vmul.f32 0.03125, %v1284_v51 }
 0xa2d   : > { %v1287_v53 = vsub.f32 %v1281_v49, %v1286_v52 }
 0xa2f   : > { %v1288_v54 = vmul.f32 %v1287_v53, %v1287_v53 }
 0xa31   : > { %v1289_v55 = vsel %vm373_vm0, %v1288_v54, 0.0 }
 0xa32   : > { %1290 = vadd.xlane.f32.xlu0 %v1289_v55 }
 0xa33   : > { %1738 = shalt.err (!%p1735_p3)
}
 0xa34   : > { %s1739_s28 = scalar_lea.hbm %s2141_s16, 512  ;;  %s1743_s25 = scalar_lea.hbm %s2232_s9, 1024 }
 0xa35   : > { %p1740_p4 = scmp.ne.s32.totalorder %s2141_s16, %s1739_s28  ;;  %p1744_p9 = scmp.lt.u32.totalorder %s2141_s16, %s2232_s9 }
 0xa36   : > { %p1745_p10 = scmp.lt.u32.totalorder %s1743_s25, %s1739_s28  ;;  %p1747_p12 = scmp.lt.u32.totalorder %s1739_s28, %s2141_s16 }
 0xa37   : > { %p1741_p7 = pnand %p1740_p4, %p1929_p5 }
 0xa38   : > { %p1746_p11 = por %p1745_p10, %p1744_p9 }
 0xa39   : > { %p1742_p8 = pneg %p1741_p7 }
 0xa3a   : > { %p1748_p13 = por %p1747_p12, %p1746_p11 }
 0xa3c   : > { %p1749_p0 = pnand %p1748_p13, %p1742_p8 }
 0xa3e   : > { %1752 = shalt.err (!%p1749_p0)
}
 0xa3f   : > { %s1839_s24 = smov 128   ;;  %s2239_s26 = scalar_lea.sflag [#allocation6], %s2033_s17  ;;  %v1491_v59 = vld [vmem:[%s2229_s6] ss:$0 sm:$0xff] }
 0xa40   : > { %1646 = dma.vmem_to_hbm [thread:$0]  (%p1929_p5), %s2136_s21, 512, %s2141_s16, %s2239_s26, %s1839_s24, %s1839_s24, %s1835_s23  }
 0xa41   : > { %s1452_s22 = sshll.u32 %s2033_s17, 3  ;;  %v1492_v61 = vld [vmem:[%s2230_s7] ss:$0 sm:$0xff]  ;;  %s1495_s27 = sshll.u32 %s1912_s13, 7 }
 0xa42   : > { %s338_s0 = scalar_lea.vmem [#allocation3], %s1452_s22  ;;  %s2179_s24 = scalar_lea.hbm %s2231_s8, %s1495_s27 }
 0xa43   : > { %s1332_s23 = sshll.u32 %s338_s0, 4  ;;  %s1314_s26 = scalar_lea.sflag [#allocation4], %s2033_s17  ;;  %s2181_s23 = int_to_ptr.vmem [resolvable:$true] %s1332_s23 }
 0xa44   : > { %s1753_s28 = scalar_lea.vmem %s2181_s23, 128  ;;  %s1840_s13 = smov [#allocation3]  }
 0xa45   : > { %p1754_p1 = scmp.ne.s32.totalorder %s2181_s23, %s1753_s28  ;;  %s1757_s22 = sshll.u32 %s1840_s13, 4  ;;  %s1758_s22 = int_to_ptr.vmem [resolvable:$false] %s1757_s22 }
 0xa46   : > { %s1759_s29 = scalar_lea.vmem %s1758_s22, 256  ;;  %p1760_p4 = scmp.lt.s32.totalorder %s2181_s23, %s1758_s22 }
 0xa47   : > { %p1755_p2 = pnand %p1754_p1, %p1929_p5  ;;  %p1761_p7 = scmp.lt.s32.totalorder %s1759_s29, %s1753_s28 }
 0xa49   : > { %p1756_p3 = pneg %p1755_p2  ;;  %p1762_p8 = por %p1761_p7, %p1760_p4 }
 0xa4b   : > { %p1763_p9 = pnand %p1762_p8, %p1756_p3 }
 0xabf   : > { %v1291_v21 = vpop.xlane.xlu0 %1290 }
 0xac0   : > { %v1292_v56 = vmul.f32 0.03125, %v1291_v21 }
 0xac2   : > { %v1293_v57 = vadd.f32 1e-12, %v1292_v56 }
 0xac4   : > { %1723 = vrsqrt.f32 %v1293_v57 }
 0xace   : > { %v1724_v58 = vpop.eup %1723 }
 0xacf   : > { %v1295_v60 = vmul.f32 %v1724_v58, %v1287_v53 }
 0xad1   : > { %v1303_v62 = vmul.f32 %v1491_v59, %v1295_v60 }
 0xad3   : > { %v1311_v63 = vadd.f32 %v1492_v61, %v1303_v62 }
 0xad5   : > { %1312 = vst.msk [vmem:[%s338_s0] sm:$0xff] %vm373_vm0, %v1311_v63 }
 0xad6   : > { %1766 = shalt.err (!%p1763_p9)
}
 0xad7   : > { %s1767_s0 = scalar_lea.hbm %s2179_s24, 128  ;;  %s1771_s25 = scalar_lea.hbm %s2231_s8, 256 }
 0xad8   : > { %p1768_p10 = scmp.ne.s32.totalorder %s2179_s24, %s1767_s0  ;;  %p1772_p13 = scmp.lt.u32.totalorder %s2179_s24, %s2231_s8 }
 0xad9   : > { %p1773_p0 = scmp.lt.u32.totalorder %s1771_s25, %s1767_s0  ;;  %p1775_p2 = scmp.lt.u32.totalorder %s1767_s0, %s2179_s24 }
 0xada   : > { %p1769_p11 = pnand %p1768_p10, %p1929_p5 }
 0xadb   : > { %p1774_p1 = por %p1773_p0, %p1772_p13 }
 0xadc   : > { %p1770_p12 = pneg %p1769_p11 }
 0xadd   : > { %p1776_p3 = por %p1775_p2, %p1774_p1 }
 0xadf   : > { %p1777_p4 = pnand %p1776_p3, %p1770_p12 }
 0xae1   : > { %1780 = shalt.err (!%p1777_p4)
}
 0xae2   : > { %1645 = dma.vmem_to_hbm [thread:$0]  (%p1929_p5), %s2181_s23, 128, %s2179_s24, %s1314_s26  }
 0xae3 PF: > { %p1656_p7 = scmp.ge.s32.totalorder %s1819_s12, 2  ;;  %s1360_s16 = sand.u32 1, %s1807_s30  }
 0xae4   : > { %s1361_s28 = scalar_lea.sflag [#allocation4], %s1360_s16 }
 0xae5   : > { %p1650_p8 = pnand %p1656_p7, %p1933_p6 }
 0xae7   : > { %1798 = dma.done.wait (!%p1650_p8), %s1361_s28, 128  }
 0xae8   : > { %1800 = vsyncadd (!%p1650_p8), %s1361_s28, 4294967168  ;;  %s1370_s13 = scalar_lea.sflag [#allocation6], %s1360_s16 }
 0xae9   : > { %1802 = dma.done.wait (!%p1650_p8), %s1370_s13, 512  }
 0xaea   : > { %1804 = vsyncadd (!%p1650_p8), %s1370_s13, 4294966784  ;;  %p23_p5 = scmp.ge.s32.totalorder %s1916_s15, 4   ;;  %s2240_s30 = smov %s1811_s10 }
 0xaeb   : > { %s2241_s10 = smov %s1815_s11  ;;  %s2242_s11 = smov %s1927_s18 }
 0xaec   : > { %s2243_s12 = smov %s1916_s15  ;;  %25 = sbr.rel (!%p23_p5) target bundleno = 7 (0x7), region = 110 }
 0xaf3   :  { %1375 = vsyncpa [#allocation4], 1 }
 0xaf4   :  { %1377 = vsyncpa [#allocation4 + $0x1], 1 }
 0xaf5   :  { %1378 = vsyncpa [#allocation6], 1 }
 0xaf6   :  { %1380 = vsyncpa [#allocation6 + $0x1], 1 }

</bundles_post_ra>
